<compile_context>
chip_gen: v5e
topology: v5e:2x2
jax: 0.10.0
libtpu: 0.0.40
codegen_flags: <defaults>
</compile_context>

<pallas_src>
import functools

import jax
import jax.numpy as jnp
from jax import lax
from jax.experimental import pallas as pl
from jax.experimental.pallas import tpu as pltpu

# Re-derive per generation: <= 64 MiB physical on v7x, 128 MiB on v5e/v6e.
_VMEM_LIMIT = 64 * 1024 * 1024


def _pick_l_tile(l, block_l):
    """Tile size along L/S rows: multiple of 8, or the full extent."""
    if l % 8 != 0 or l <= block_l:
        return l
    return max(8, (block_l // 8) * 8)


# ----------------------------------------------------------------------------
# Projection kernels (torch.nn.Linear semantics; weights pre-transposed to
# (Cin, Cout) and stored bf16).  They emit HEAD-MAJOR bf16 output (H, tl, dh)
# per tile so the attention kernel gets lane-clean per-head blocks.
# ----------------------------------------------------------------------------
def _proj_heads_kernel(x_ref, w_ref, b_ref, o_ref, *, n_heads):
    x = x_ref[...].astype(jnp.bfloat16)
    y = jnp.dot(x, w_ref[...], preferred_element_type=jnp.float32) + b_ref[...]
    dh = y.shape[-1] // n_heads
    for h in range(n_heads):                       # unrolled head-major store
        o_ref[h] = y[:, h * dh:(h + 1) * dh].astype(o_ref.dtype)


def _dual_proj_heads_kernel(xc_ref, xp_ref, wc_ref, bc_ref, wp_ref, bp_ref, o_ref,
                            *, n_heads, cat):
    xc = xc_ref[...].astype(jnp.bfloat16)
    xp = xp_ref[...].astype(jnp.bfloat16)
    yc = jnp.dot(xc, wc_ref[...], preferred_element_type=jnp.float32) + bc_ref[...]
    yp = jnp.dot(xp, wp_ref[...], preferred_element_type=jnp.float32) + bp_ref[...]
    y = jnp.concatenate([yc, yp], axis=-1) if cat else (yc + yp)
    dh = y.shape[-1] // n_heads
    for h in range(n_heads):
        o_ref[h] = y[:, h * dh:(h + 1) * dh].astype(o_ref.dtype)


def linear_heads(x, w_t, b2, *, n_heads, block_l=256):
    """x: (N, L, Cin), w_t: (Cin, Cout) bf16, b2: (1, Cout) f32 -> (N, H, L, Cout/H) bf16."""
    n, l, cin = x.shape
    cout = w_t.shape[1]
    dh = cout // n_heads
    tl = _pick_l_tile(l, block_l)
    grid = (n, pl.cdiv(l, tl))
    cost = pl.CostEstimate(
        flops=2 * n * l * cin * cout,
        transcendentals=0,
        bytes_accessed=4 * n * l * cin + 2 * cin * cout + 4 * cout + 2 * n * l * cout)
    return pl.pallas_call(
        functools.partial(_proj_heads_kernel, n_heads=n_heads),
        out_shape=jax.ShapeDtypeStruct((n, n_heads, l, dh), jnp.bfloat16),
        grid=grid,
        in_specs=[
            pl.BlockSpec((None, tl, cin), lambda b, i: (b, i, 0)),
            pl.BlockSpec((cin, cout), lambda b, i: (0, 0)),
            pl.BlockSpec((1, cout), lambda b, i: (0, 0)),
        ],
        out_specs=pl.BlockSpec((None, n_heads, tl, dh), lambda b, i: (b, 0, i, 0)),
        compiler_params=pltpu.CompilerParams(
            dimension_semantics=("parallel", "parallel"),
            vmem_limit_bytes=_VMEM_LIMIT),
        cost_estimate=cost,
    )(x, w_t, b2)


def dual_linear_heads(x_c, x_p, wc_t, bc2, wp_t, bp2, *, mode, n_heads, block_l=256):
    """Fused pair of projections ('cat': concat, 'add': sum), head-major bf16 output."""
    n, l, cin = x_c.shape
    cout = wc_t.shape[1]
    cq = 2 * cout if mode == "cat" else cout
    dh = cq // n_heads
    tl = _pick_l_tile(l, block_l)
    grid = (n, pl.cdiv(l, tl))
    cost = pl.CostEstimate(
        flops=4 * n * l * cin * cout,
        transcendentals=0,
        bytes_accessed=8 * n * l * cin + 4 * cin * cout + 8 * cout + 2 * n * l * cq)
    return pl.pallas_call(
        functools.partial(_dual_proj_heads_kernel, n_heads=n_heads, cat=(mode == "cat")),
        out_shape=jax.ShapeDtypeStruct((n, n_heads, l, dh), jnp.bfloat16),
        grid=grid,
        in_specs=[
            pl.BlockSpec((None, tl, cin), lambda b, i: (b, i, 0)),
            pl.BlockSpec((None, tl, cin), lambda b, i: (b, i, 0)),
            pl.BlockSpec((cin, cout), lambda b, i: (0, 0)),
            pl.BlockSpec((1, cout), lambda b, i: (0, 0)),
            pl.BlockSpec((cin, cout), lambda b, i: (0, 0)),
            pl.BlockSpec((1, cout), lambda b, i: (0, 0)),
        ],
        out_specs=pl.BlockSpec((None, n_heads, tl, dh), lambda b, i: (b, 0, i, 0)),
        compiler_params=pltpu.CompilerParams(
            dimension_semantics=("parallel", "parallel"),
            vmem_limit_bytes=_VMEM_LIMIT),
        cost_estimate=cost,
    )(x_c, x_p, wc_t, bc2, wp_t, bp2)


# ----------------------------------------------------------------------------
# Attention + fused output projection.
# grid = (N, L_tiles, H); H is the reduction axis (accumulate o_h @ wo_h into scratch).
# ----------------------------------------------------------------------------
def _attn_kernel(*refs, has_mask):
    if has_mask:
        q_ref, k_ref, v_ref, m_ref, wo_ref, bo_ref, o_ref, acc_ref = refs
    else:
        q_ref, k_ref, v_ref, wo_ref, bo_ref, o_ref, acc_ref = refs
    h = pl.program_id(2)

    @pl.when(h == 0)
    def _():
        acc_ref[...] = jnp.zeros_like(acc_ref)

    # QK^T: contract head dims (no transpose).  1/sqrt(d) is pre-folded into Wq/bq.
    s = lax.dot_general(q_ref[...], k_ref[...],
                        dimension_numbers=(((1,), (1,)), ((), ())),
                        preferred_element_type=jnp.float32)        # (tl, S) f32
    if has_mask:
        s = s + m_ref[...].astype(jnp.float32)

    # f32 softmax statistics; probs cast to bf16 for the PV matmul.
    # NOTE: fully -inf masked rows would give 0/0 here (same as the PyTorch reference).
    s_max = jnp.max(s, axis=-1, keepdims=True)
    p = jnp.exp(s - s_max)
    l_sum = jnp.sum(p, axis=-1, keepdims=True)
    o = jnp.dot(p.astype(jnp.bfloat16), v_ref[...],
                preferred_element_type=jnp.float32)                # (tl, dv) f32
    o = o * pl.reciprocal(l_sum, approx=True)

    # Fused output projection: accumulate this head's contribution o_h @ wo_h.
    acc_ref[...] += jnp.dot(o.astype(jnp.bfloat16), wo_ref[...],
                            preferred_element_type=jnp.float32)    # (tl, C) f32

    @pl.when(h == pl.num_programs(2) - 1)
    def _():
        o_ref[...] = (acc_ref[...] + bo_ref[...]).astype(o_ref.dtype)


def attention_out_proj(q, k, v, attn_mask, wo_h, bo, *, block_l=256):
    """q:(N,H,L,dq) k:(N,H,S,dq) v:(N,H,S,dv) bf16, mask:(N,H,L,S) or None,
    wo_h:(H,dv,C) bf16, bo:(1,C) f32 -> (N,L,C) f32 (out_proj fused)."""
    n, n_heads, l, dq = q.shape
    s_len = k.shape[2]
    dv = v.shape[3]
    c = wo_h.shape[2]
    has_mask = attn_mask is not None
    tl = _pick_l_tile(l, block_l)
    grid = (n, pl.cdiv(l, tl), n_heads)

    in_specs = [
        pl.BlockSpec((None, None, tl, dq), lambda b, i, h: (b, h, i, 0)),
        pl.BlockSpec((None, None, s_len, dq), lambda b, i, h: (b, h, 0, 0)),
        pl.BlockSpec((None, None, s_len, dv), lambda b, i, h: (b, h, 0, 0)),
    ]
    args = [q, k, v]
    if has_mask:
        in_specs.append(pl.BlockSpec((None, None, tl, s_len), lambda b, i, h: (b, h, i, 0)))
        args.append(attn_mask)
    in_specs += [
        pl.BlockSpec((None, dv, c), lambda b, i, h: (h, 0, 0)),
        pl.BlockSpec((1, c), lambda b, i, h: (0, 0)),
    ]
    args += [wo_h, bo]

    mask_bytes = n * n_heads * l * s_len * attn_mask.dtype.itemsize if has_mask else 0
    cost = pl.CostEstimate(
        flops=2 * n * n_heads * l * (s_len * (dq + dv) + dv * c),
        transcendentals=n * n_heads * l * s_len,
        bytes_accessed=(2 * n * n_heads * (l * dq + s_len * (dq + dv))
                        + mask_bytes + 4 * n * l * c + 2 * n_heads * dv * c))

    return pl.pallas_call(
        functools.partial(_attn_kernel, has_mask=has_mask),
        out_shape=jax.ShapeDtypeStruct((n, l, c), jnp.float32),
        grid=grid,
        in_specs=in_specs,
        out_specs=pl.BlockSpec((None, tl, c), lambda b, i, h: (b, i, 0)),
        scratch_shapes=[pltpu.VMEM((tl, c), jnp.float32)],
        compiler_params=pltpu.CompilerParams(
            dimension_semantics=("parallel", "parallel", "arbitrary"),
            vmem_limit_bytes=_VMEM_LIMIT),
        cost_estimate=cost,
    )(*args)


# ----------------------------------------------------------------------------
# Parameter preparation (hoisted out of the forward): transpose torch-layout
# (Cout, Cin) -> (Cin, Cout), cast weights to bf16, fold 1/sqrt(d) into the Q
# projections, reshape wo^T head-major to (H, dv, C).
# ----------------------------------------------------------------------------
def prepare_params(torch_params, n_heads):
    embed_dim = torch_params["wq_c"].shape[0]
    inv_d = 1.0 / float((embed_dim // n_heads) ** 0.5)
    dv = embed_dim // n_heads
    p = {}
    for name in ("wq_c", "wq_p"):
        p[name] = (jnp.transpose(torch_params[name]) * inv_d).astype(jnp.bfloat16)
    for name in ("bq_c", "bq_p"):
        p[name] = (torch_params[name] * inv_d).reshape(1, -1).astype(jnp.float32)
    for name in ("wk_c", "wk_p", "wv"):
        p[name] = jnp.transpose(torch_params[name]).astype(jnp.bfloat16)
    for name in ("bk_c", "bk_p", "bv"):
        p[name] = torch_params[name].reshape(1, -1).astype(jnp.float32)
    p["wo_h"] = jnp.transpose(torch_params["wo"]).reshape(n_heads, dv, embed_dim).astype(jnp.bfloat16)
    p["bo"] = torch_params["bo"].reshape(1, -1).astype(jnp.float32)
    return p


# ----------------------------------------------------------------------------
# MultiheadAttentionV2 forward (mode in {'cat', 'add'})
# ----------------------------------------------------------------------------
def multihead_attention_v2(prepared, q_c, q_p, k_c, k_p, v, attn_mask=None,
                           *, n_heads, mode="cat", block_l=256):
    assert mode in ("add", "cat")
    # Fused dual projections -> head-major bf16 Q/K; single projection -> head-major V.
    q = dual_linear_heads(q_c, q_p, prepared["wq_c"], prepared["bq_c"],
                          prepared["wq_p"], prepared["bq_p"],
                          mode=mode, n_heads=n_heads, block_l=block_l)
    k = dual_linear_heads(k_c, k_p, prepared["wk_c"], prepared["bk_c"],
                          prepared["wk_p"], prepared["bk_p"],
                          mode=mode, n_heads=n_heads, block_l=block_l)
    vv = linear_heads(v, prepared["wv"], prepared["bv"], n_heads=n_heads, block_l=block_l)
    # Attention with the output projection fused into the epilogue.
    return attention_out_proj(q, k, vv, attn_mask, prepared["wo_h"], prepared["bo"],
                              block_l=block_l)


# ----------------------------------------------------------------------------
# Pure-JAX f32 reference (mirrors the PyTorch forward) for a correctness check.
# ----------------------------------------------------------------------------
def _reference(params, q_c, q_p, k_c, k_p, v, attn_mask, *, n_heads, mode):
    def lin(x, w, b):
        return x @ w.T + b

    embed_dim = q_c.shape[-1]
    d = (embed_dim // n_heads) ** 0.5
    if mode == "cat":
        q = jnp.concatenate([lin(q_c, params["wq_c"], params["bq_c"]),
                             lin(q_p, params["wq_p"], params["bq_p"])], axis=-1)
        k = jnp.concatenate([lin(k_c, params["wk_c"], params["bk_c"]),
                             lin(k_p, params["wk_p"], params["bk_p"])], axis=-1)
    else:
        q = lin(q_c, params["wq_c"], params["bq_c"]) + lin(q_p, params["wq_p"], params["bq_p"])
        k = lin(k_c, params["wk_c"], params["bk_c"]) + lin(k_p, params["wk_p"], params["bk_p"])
    vv = lin(v, params["wv"], params["bv"])

    n, l, cq = q.shape
    s = k.shape[1]
    h = n_heads
    qh = q.reshape(n, l, h, cq // h).transpose(0, 2, 1, 3)
    kh = k.reshape(n, s, h, cq // h).transpose(0, 2, 1, 3)
    vh = vv.reshape(n, s, h, embed_dim // h).transpose(0, 2, 1, 3)

    attn = jnp.einsum("nhld,nhsd->nhls", qh / d, kh)
    if attn_mask is not None:
        attn = attn + attn_mask
    attn = jax.nn.softmax(attn, axis=-1)
    out = jnp.einsum("nhls,nhsd->nhld", attn, vh)
    out = out.transpose(0, 2, 1, 3).reshape(n, l, embed_dim)
    return lin(out, params["wo"], params["bo"])


def _assert_close(name, out, ref):
    err = float(jnp.max(jnp.abs(out - ref)))
    scale = float(jnp.max(jnp.abs(ref)))
    # bf16 MXU operands -> relative tolerance vs the f32 reference.
    assert err <= 5e-2 * scale + 5e-4, (name, err, scale)


if __name__ == "__main__":
    # Small, deterministic shapes.
    N, L, S, C, H = 2, 8, 8, 32, 4

    key = jax.random.PRNGKey(0)
    keys = jax.random.split(key, 20)

    def w_init(k):
        return jax.random.normal(k, (C, C), jnp.float32) * 0.05

    def b_init(k):
        return jax.random.normal(k, (C,), jnp.float32) * 0.01

    params = {
        "wq_c": w_init(keys[0]), "bq_c": b_init(keys[1]),
        "wq_p": w_init(keys[2]), "bq_p": b_init(keys[3]),
        "wk_c": w_init(keys[4]), "bk_c": b_init(keys[5]),
        "wk_p": w_init(keys[6]), "bk_p": b_init(keys[7]),
        "wv":   w_init(keys[8]), "bv":   b_init(keys[9]),
        "wo":   w_init(keys[10]), "bo":  b_init(keys[11]),
    }
    prepared = prepare_params(params, n_heads=H)   # hoisted: transpose + bf16 + 1/sqrt(d) fold

    q_c = jax.random.normal(keys[12], (N, L, C), jnp.float32)
    q_p = jax.random.normal(keys[13], (N, L, C), jnp.float32)
    k_c = jax.random.normal(keys[14], (N, S, C), jnp.float32)
    k_p = jax.random.normal(keys[15], (N, S, C), jnp.float32)
    v   = jax.random.normal(keys[16], (N, S, C), jnp.float32)
    # Pass the mask in bf16 to halve its HBM stream; reference uses identical values.
    attn_mask_bf16 = (0.1 * jax.random.normal(keys[17], (N, H, L, S), jnp.float32)
                      ).astype(jnp.bfloat16)
    attn_mask_ref = attn_mask_bf16.astype(jnp.float32)

    # --- 'cat' mode with attention mask -------------------------------------
    out_cat = multihead_attention_v2(prepared, q_c, q_p, k_c, k_p, v, attn_mask_bf16,
                                     n_heads=H, mode="cat")
    out_cat = jax.block_until_ready(out_cat)
    ref_cat = _reference(params, q_c, q_p, k_c, k_p, v, attn_mask_ref,
                         n_heads=H, mode="cat")
    assert out_cat.shape == (N, L, C)
    _assert_close("cat", out_cat, ref_cat)

    # --- 'add' mode without a mask (exercises the specialized no-mask path) --
    out_add = multihead_attention_v2(prepared, q_c, q_p, k_c, k_p, v, None,
                                     n_heads=H, mode="add")
    out_add = jax.block_until_ready(out_add)
    ref_add = _reference(params, q_c, q_p, k_c, k_p, v, None,
                         n_heads=H, mode="add")
    assert out_add.shape == (N, L, C)
    _assert_close("add", out_add, ref_add)

    print("KERNEL_OK")
</pallas_src>

<mosaic_0001>
module attributes {stable_mosaic.version = 11 : i64} {
  func.func @_dual_proj_heads_kernel(%arg0: i32, %arg1: i32, %arg2: memref<1x8x32xf32, #tpu.memory_space<vmem>>, %arg3: memref<1x8x32xf32, #tpu.memory_space<vmem>>, %arg4: memref<32x32xbf16, #tpu.memory_space<vmem>>, %arg5: memref<1x32xf32, #tpu.memory_space<vmem>>, %arg6: memref<32x32xbf16, #tpu.memory_space<vmem>>, %arg7: memref<1x32xf32, #tpu.memory_space<vmem>>, %arg8: memref<1x4x8x16xbf16, #tpu.memory_space<vmem>>) attributes {dimension_semantics = [#tpu.dimension_semantics<parallel>, #tpu.dimension_semantics<parallel>], iteration_bounds = array<i64: 2, 1>, scalar_prefetch = 0 : i64, scratch_operands = 0 : i64, tpu.core_type = #tpu.core_type<tc>, window_params = [{transform_indices = @transform_0, window_bounds = array<i64: 1, 8, 32>}, {transform_indices = @transform_1, window_bounds = array<i64: 1, 8, 32>}, {pipeline_mode = #tpu.pipeline_mode<synchronous>, transform_indices = @transform_2, window_bounds = array<i64: 32, 32>}, {pipeline_mode = #tpu.pipeline_mode<synchronous>, transform_indices = @transform_3, window_bounds = array<i64: 1, 32>}, {pipeline_mode = #tpu.pipeline_mode<synchronous>, transform_indices = @transform_4, window_bounds = array<i64: 32, 32>}, {pipeline_mode = #tpu.pipeline_mode<synchronous>, transform_indices = @transform_5, window_bounds = array<i64: 1, 32>}, {transform_indices = @transform_6, window_bounds = array<i64: 1, 4, 8, 16>}]} {
    %c0 = arith.constant 0 : index
    %c0_0 = arith.constant 0 : index
    %c0_1 = arith.constant 0 : index
    %0 = vector.load %arg2[%c0, %c0_0, %c0_1] : memref<1x8x32xf32, #tpu.memory_space<vmem>>, vector<1x8x32xf32>
    %1 = vector.shape_cast %0 : vector<1x8x32xf32> to vector<8x32xf32>
    %2 = arith.truncf %1 : vector<8x32xf32> to vector<8x32xbf16>
    %c0_2 = arith.constant 0 : index
    %c0_3 = arith.constant 0 : index
    %c0_4 = arith.constant 0 : index
    %3 = vector.load %arg3[%c0_2, %c0_3, %c0_4] : memref<1x8x32xf32, #tpu.memory_space<vmem>>, vector<1x8x32xf32>
    %4 = vector.shape_cast %3 : vector<1x8x32xf32> to vector<8x32xf32>
    %5 = arith.truncf %4 : vector<8x32xf32> to vector<8x32xbf16>
    %c0_5 = arith.constant 0 : index
    %c0_6 = arith.constant 0 : index
    %6 = vector.load %arg4[%c0_5, %c0_6] : memref<32x32xbf16, #tpu.memory_space<vmem>>, vector<32x32xbf16>
    %cst = arith.constant dense<0.000000e+00> : vector<8x32xf32>
    %7 = tpu.matmul %2, %6, %cst {dimension_numbers = #tpu.dot_dimension_numbers<[1], [0], [0], [1], [0, 0, 1, 1], [], []>} : vector<8x32xbf16>, vector<32x32xbf16>, vector<8x32xf32> -> vector<8x32xf32>
    %c0_7 = arith.constant 0 : index
    %c0_8 = arith.constant 0 : index
    %8 = vector.load %arg5[%c0_7, %c0_8] : memref<1x32xf32, #tpu.memory_space<vmem>>, vector<1x32xf32>
    %9 = vector.broadcast %8 : vector<1x32xf32> to vector<8x32xf32>
    %10 = arith.addf %7, %9 : vector<8x32xf32>
    %c0_9 = arith.constant 0 : index
    %c0_10 = arith.constant 0 : index
    %11 = vector.load %arg6[%c0_9, %c0_10] : memref<32x32xbf16, #tpu.memory_space<vmem>>, vector<32x32xbf16>
    %cst_11 = arith.constant dense<0.000000e+00> : vector<8x32xf32>
    %12 = tpu.matmul %5, %11, %cst_11 {dimension_numbers = #tpu.dot_dimension_numbers<[1], [0], [0], [1], [0, 0, 1, 1], [], []>} : vector<8x32xbf16>, vector<32x32xbf16>, vector<8x32xf32> -> vector<8x32xf32>
    %c0_12 = arith.constant 0 : index
    %c0_13 = arith.constant 0 : index
    %13 = vector.load %arg7[%c0_12, %c0_13] : memref<1x32xf32, #tpu.memory_space<vmem>>, vector<1x32xf32>
    %14 = vector.broadcast %13 : vector<1x32xf32> to vector<8x32xf32>
    %15 = arith.addf %12, %14 : vector<8x32xf32>
    %16 = tpu.concatenate %10, %15 in 1 : vector<8x32xf32>, vector<8x32xf32> -> vector<8x64xf32>
    %17 = vector.extract_strided_slice %16 {offsets = [0, 0], sizes = [8, 16], strides = [1, 1]} : vector<8x64xf32> to vector<8x16xf32>
    %18 = arith.truncf %17 : vector<8x16xf32> to vector<8x16xbf16>
    %c0_14 = arith.constant 0 : index
    %c0_15 = arith.constant 0 : index
    %c0_16 = arith.constant 0 : index
    %c0_17 = arith.constant 0 : index
    %19 = vector.load %arg8[%c0_14, %c0_15, %c0_16, %c0_17] : memref<1x4x8x16xbf16, #tpu.memory_space<vmem>>, vector<1x1x8x16xbf16>
    %20 = vector.shape_cast %19 : vector<1x1x8x16xbf16> to vector<8x16xbf16>
    %21 = vector.shape_cast %18 : vector<8x16xbf16> to vector<1x1x8x16xbf16>
    tpu.vector_store %arg8[%c0_14, %c0_15, %c0_16, %c0_17], %21 {strides = array<i32>} : memref<1x4x8x16xbf16, #tpu.memory_space<vmem>>, vector<1x1x8x16xbf16>,
    %22 = vector.extract_strided_slice %16 {offsets = [0, 16], sizes = [8, 16], strides = [1, 1]} : vector<8x64xf32> to vector<8x16xf32>
    %23 = arith.truncf %22 : vector<8x16xf32> to vector<8x16xbf16>
    %c0_18 = arith.constant 0 : index
    %c1 = arith.constant 1 : index
    %c0_19 = arith.constant 0 : index
    %c0_20 = arith.constant 0 : index
    %24 = vector.load %arg8[%c0_18, %c1, %c0_19, %c0_20] : memref<1x4x8x16xbf16, #tpu.memory_space<vmem>>, vector<1x1x8x16xbf16>
    %25 = vector.shape_cast %24 : vector<1x1x8x16xbf16> to vector<8x16xbf16>
    %26 = vector.shape_cast %23 : vector<8x16xbf16> to vector<1x1x8x16xbf16>
    tpu.vector_store %arg8[%c0_18, %c1, %c0_19, %c0_20], %26 {strides = array<i32>} : memref<1x4x8x16xbf16, #tpu.memory_space<vmem>>, vector<1x1x8x16xbf16>,
    %27 = vector.extract_strided_slice %16 {offsets = [0, 32], sizes = [8, 16], strides = [1, 1]} : vector<8x64xf32> to vector<8x16xf32>
    %28 = arith.truncf %27 : vector<8x16xf32> to vector<8x16xbf16>
    %c0_21 = arith.constant 0 : index
    %c2 = arith.constant 2 : index
    %c0_22 = arith.constant 0 : index
    %c0_23 = arith.constant 0 : index
    %29 = vector.load %arg8[%c0_21, %c2, %c0_22, %c0_23] : memref<1x4x8x16xbf16, #tpu.memory_space<vmem>>, vector<1x1x8x16xbf16>
    %30 = vector.shape_cast %29 : vector<1x1x8x16xbf16> to vector<8x16xbf16>
    %31 = vector.shape_cast %28 : vector<8x16xbf16> to vector<1x1x8x16xbf16>
    tpu.vector_store %arg8[%c0_21, %c2, %c0_22, %c0_23], %31 {strides = array<i32>} : memref<1x4x8x16xbf16, #tpu.memory_space<vmem>>, vector<1x1x8x16xbf16>,
    %32 = vector.extract_strided_slice %16 {offsets = [0, 48], sizes = [8, 16], strides = [1, 1]} : vector<8x64xf32> to vector<8x16xf32>
    %33 = arith.truncf %32 : vector<8x16xf32> to vector<8x16xbf16>
    %c0_24 = arith.constant 0 : index
    %c3 = arith.constant 3 : index
    %c0_25 = arith.constant 0 : index
    %c0_26 = arith.constant 0 : index
    %34 = vector.load %arg8[%c0_24, %c3, %c0_25, %c0_26] : memref<1x4x8x16xbf16, #tpu.memory_space<vmem>>, vector<1x1x8x16xbf16>
    %35 = vector.shape_cast %34 : vector<1x1x8x16xbf16> to vector<8x16xbf16>
    %36 = vector.shape_cast %33 : vector<8x16xbf16> to vector<1x1x8x16xbf16>
    tpu.vector_store %arg8[%c0_24, %c3, %c0_25, %c0_26], %36 {strides = array<i32>} : memref<1x4x8x16xbf16, #tpu.memory_space<vmem>>, vector<1x1x8x16xbf16>,
    return
  }
  func.func @transform_0(%arg0: i32, %arg1: i32) -> (i32, i32, i32) {
    %c0_i32 = arith.constant 0 : i32
    %c0_i32_0 = arith.constant 0 : i32
    return %arg0, %arg1, %c0_i32 : i32, i32, i32
  }
  func.func @transform_1(%arg0: i32, %arg1: i32) -> (i32, i32, i32) {
    %c0_i32 = arith.constant 0 : i32
    %c0_i32_0 = arith.constant 0 : i32
    return %arg0, %arg1, %c0_i32 : i32, i32, i32
  }
  func.func @transform_2(%arg0: i32, %arg1: i32) -> (i32, i32) {
    %c0_i32 = arith.constant 0 : i32
    %c0_i32_0 = arith.constant 0 : i32
    %c0_i32_1 = arith.constant 0 : i32
    return %c0_i32, %c0_i32_0 : i32, i32
  }
  func.func @transform_3(%arg0: i32, %arg1: i32) -> (i32, i32) {
    %c0_i32 = arith.constant 0 : i32
    %c0_i32_0 = arith.constant 0 : i32
    %c0_i32_1 = arith.constant 0 : i32
    return %c0_i32, %c0_i32_0 : i32, i32
  }
  func.func @transform_4(%arg0: i32, %arg1: i32) -> (i32, i32) {
    %c0_i32 = arith.constant 0 : i32
    %c0_i32_0 = arith.constant 0 : i32
    %c0_i32_1 = arith.constant 0 : i32
    return %c0_i32, %c0_i32_0 : i32, i32
  }
  func.func @transform_5(%arg0: i32, %arg1: i32) -> (i32, i32) {
    %c0_i32 = arith.constant 0 : i32
    %c0_i32_0 = arith.constant 0 : i32
    %c0_i32_1 = arith.constant 0 : i32
    return %c0_i32, %c0_i32_0 : i32, i32
  }
  func.func @transform_6(%arg0: i32, %arg1: i32) -> (i32, i32, i32, i32) {
    %c0_i32 = arith.constant 0 : i32
    %c0_i32_0 = arith.constant 0 : i32
    %c0_i32_1 = arith.constant 0 : i32
    return %arg0, %c0_i32, %arg1, %c0_i32_0 : i32, i32, i32, i32
  }
}

</mosaic_0001>

<bundles_post_ra>
// kernel: tpu_custom_call.1
= control target key start
LH: loop header
LB: loop body
LE: loop exit
PB: predicated region body
PF: predicated region fallthrough
CT: control target
= control target key end

     0   :  { %s1186_s0 = inlined_call_operand.hbm [shape: f32[2,8,32], index: 0, kind: input, shape index: {}]   ;;  %s1187_s1 = inlined_call_operand.hbm [shape: f32[2,8,32], index: 1, kind: input, shape index: {}]   ;;  %s1188_s2 = inlined_call_operand.hbm [shape: bf16[32,32], index: 2, kind: input, shape index: {}]   ;;  %s1189_s3 = inlined_call_operand.vmem [shape: f32[1,32], index: 3, kind: input, shape index: {}]   ;;  %s1190_s4 = inlined_call_operand.hbm [shape: bf16[32,32], index: 4, kind: input, shape index: {}]   ;;  %s1191_s5 = inlined_call_operand.vmem [shape: f32[1,32], index: 5, kind: input, shape index: {}]   ;;  %s1192_s6 = inlined_call_operand.hbm [shape: bf16[2,4,8,16], index: 6, kind: output, shape index: {}]  }
   0x1   :  { %1197 = sst [smem:[#allocation21_spill]] %s1188_s2 }
   0x2   :  { %1198 = sst [smem:[#allocation22_spill]] %s1190_s4 }
   0x3   :  { %11 = vsyncpa [#allocation3], 0 }
   0x4   :  { %13 = vsyncpa [#allocation3 + $0x1], 0 }
   0x5   :  { %14 = vsyncpa [#allocation6], 0 }
   0x6   :  { %16 = vsyncpa [#allocation6 + $0x1], 0 }
   0x7   :  { %17 = vsyncpa [#allocation9], 0 }
   0x8   :  { %18 = vsyncpa [#allocation4], 0 }
   0x9   :  { %20 = vsyncpa [#allocation4 + $0x1], 0  ;;  %s1013_s21 = smov 0   ;;  %s1015_s22 = smov 0  }
   0xa   :  { %s1017_s23 = smov 0   ;;  %s1019_s24 = smov 0  }
   0xb   :  { %s1021_s25 = smov 0   ;;  %s1023_s26 = smov 0  }
   0xc LB: > { %1199 = sst [smem:[#allocation16_spill]] %s954_s23  ;;  %s1044_s27 = sadd.s32 4294967295, %s966_s26   ;;  %s966_s26 = sphi %s1023_s26, %s26_s26   ;;  %s962_s25 = sphi %s1021_s25, %s1215_s25   ;;  %s958_s24 = sphi %s1019_s24, %s1214_s24   ;;  %s954_s23 = sphi %s1017_s23, %s1213_s23   ;;  %s950_s22 = sphi %s1015_s22, %s1217_s22   ;;  %s946_s21 = sphi %s1013_s21, %s1216_s21  }
   0xd   : > { %1200 = sst [smem:[#allocation17_spill]] %s962_s25  ;;  %p609_p0 = scmp.ge.s32.totalorder %s966_s26, 1 }
   0xe   : > { %p61_p1 = scmp.eq.s32.totalorder %s1044_s27, 0  ;;  %p211_p2 = scmp.lt.s32.totalorder %s966_s26, 3 }
   0xf   : > { %s1201_s2 = sld [smem:[#allocation21_spill]]  ;;  %s968_s8 = smov [#allocation7]  }
  0x10   : > { %p1052_p3 = pnand %p609_p0, %p211_p2  ;;  %s224_s9 = sshll.u32 %s968_s8, 4  ;;  %s225_s9 = int_to_ptr.vmem [resolvable:$true] %s224_s9 }
  0x11   : > { %p612_p6 = scmp.ge.s32.totalorder %s966_s26, 2  ;;  %s1203_s4 = sld [smem:[#allocation22_spill]] }
  0x12   : > { %p668_p4 = pneg %p1052_p3  ;;  %s969_s13 = smov 64  }
  0x13   : > { %s970_s14 = smov 4   ;;  %s971_s15 = smov [#allocation8]  }
  0x14   : > { %p669_p5 = pnand %p668_p4, %p61_p1  ;;  %s241_s16 = sshll.u32 %s971_s15, 4  ;;  %s242_s16 = int_to_ptr.vmem [resolvable:$true] %s241_s16 }
  0x15   : > { %s222_s30 = sshll.u32 %s1201_s2, 4  ;;  %s608_s17 = sadd.s32 4294967294, %s966_s26   ;;  %s223_s30 = int_to_ptr.hbm [resolvable:$true] %s222_s30 }
  0x16   : > { %671 = dma.hbm_to_vmem [thread:$0]  (!%p669_p5), %s223_s30, 256, %s225_s9, [#allocation6], %s969_s13, %s969_s13, %s970_s14  }
  0x17   : > { %s239_s12 = sshll.u32 %s1203_s4, 4  ;;  %s38_s18 = sadd.s32 1, %s962_s25  ;;  %s240_s12 = int_to_ptr.hbm [resolvable:$true] %s239_s12 }
  0x18   : > { %674 = dma.hbm_to_vmem [thread:$0]  (!%p669_p5), %s240_s12, 256, %s242_s16, [#allocation9], %s969_s13, %s969_s13, %s970_s14  }
  0x19   : > { %p40_p7 = scmp.ge.s32.totalorder %s38_s18, 2  ;;  %s47_s19 = sadd.s32 1, %s954_s23 }
  0x1a   : > { %p54_p8 = scmp.ne.s32.totalorder %s954_s23, %s950_s22  ;;  %p55_p9 = scmp.eq.s32.totalorder %s966_s26, 0 }
  0x1b   : > { %s1219_s18 = smov (%p40_p7, %s38_s18), 0  ;;  %p60_p11 = scmp.ne.s32.totalorder %s950_s22, %s946_s21 }
  0x1c   : > { %1204 = sst [smem:[#allocation18_spill]] %s1219_s18  ;;  %p1072_p10 = por %p55_p9, %p54_p8 }
  0x1d   : > { %s42_s28 = ssub.s32 %s962_s25, %s1219_s18  ;;  %p198_p12 = scmp.eq.s32.totalorder %s1044_s27, 1 }
  0x1e   : > { %p45_p13 = scmp.eq.s32.totalorder %s42_s28, 0  ;;  %p1083_p0 = por %p61_p1, %p60_p11 }
  0x1f   : > { %p1087_p2 = por %p198_p12, %p54_p8  ;;  %p204_p4 = scmp.eq.s32.totalorder %s608_s17, 1 }
  0x20   : > { %s1092_s8 = scalar_select %p45_p13, %s954_s23, %s47_s19  }
  0x21   : > { %p1094_p5 = por %p204_p4, %p60_p11  ;;  %p688_p7 = scmp.lt.s32.totalorder %s966_s26, 2 }
  0x22   : > { %1208 = sst [smem:[#allocation19_spill]] %s1092_s8  ;;  %s258_s10 = sand.u32 1, %s954_s23  }
  0x23   : > { %s1209_s9 = scalar_select %p1094_p5, 1, 0 }
  0x24   : > { %s614_s11 = sshll.u32 %s962_s25, 3  ;;  %s613_s12 = sshll.u32 %s258_s10, 3 }
  0x25   : > { %1210 = sst [smem:[#allocation20_spill]] %s1209_s9  ;;  %s267_s15 = scalar_lea.hbm %s1186_s0, %s614_s11 }
  0x26   : > { %s269_s16 = sshll.u32 %s267_s15, 4  ;;  %s262_s28 = scalar_lea.vmem [#allocation2], %s613_s12  ;;  %s270_s16 = int_to_ptr.hbm [resolvable:$true] %s269_s16 }
  0x27   : > { %s271_s2 = sshll.u32 %s262_s28, 4  ;;  %p676_p8 = pnand %p688_p7, %p1072_p10  ;;  %s272_s2 = int_to_ptr.vmem [resolvable:$true] %s271_s2 }
  0x28   : > { %s287_s4 = scalar_lea.hbm %s1187_s1, %s614_s11  ;;  %s278_s18 = sand.u32 1, %s966_s26  }
  0x29   : > { %s259_s8 = scalar_lea.sflag [#allocation3], %s258_s10  ;;  %s289_s25 = sshll.u32 %s287_s4, 4  ;;  %s290_s25 = int_to_ptr.hbm [resolvable:$true] %s289_s25 }
  0x2a   : > { %678 = dma.hbm_to_vmem [thread:$0]  (!%p676_p8), %s270_s16, 128, %s272_s2, %s259_s8  }
  0x2b   : > { %s282_s23 = scalar_lea.vmem [#allocation5], %s613_s12  ;;  %s279_s13 = scalar_lea.sflag [#allocation6], %s278_s18 }
  0x2c   : > { %s291_s9 = sshll.u32 %s282_s23, 4  ;;  %300 = sbr.rel (%p1052_p3) target bundleno = 438 (0x1b6), region = 44  ;;  %s292_s9 = int_to_ptr.vmem [resolvable:$true] %s291_s9 }
  0x2d   : > { %681 = dma.hbm_to_vmem [thread:$0]  (!%p676_p8), %s290_s25, 128, %s292_s9, %s279_s13  }
  0x2e   : > { %s1113_s20 = sand.u32 (!%p1052_p3), 1, %s950_s22  }
  0x2f   : > { %s618_s11 = sshll.u32 (!%p1052_p3), %s1113_s20, 3  ;;  %s303_s14 = scalar_lea.sflag (!%p1052_p3), [#allocation3], %s1113_s20 }
  0x30   : > { %s306_s10 = scalar_lea.vmem (!%p1052_p3), [#allocation2], %s618_s11 }
  0x31   : > { %925 = dma.done.wait (%p1083_p0), %s303_s14, 128  }
  0x32   : > { %927 = vsyncadd (%p1083_p0), %s303_s14, 4294967168  ;;  %s312_s2 = sand.u32 1, %s1044_s27   ;;  %s316_s23 = scalar_lea.vmem [#allocation5], %s618_s11 }
  0x33   : > { %s313_s4 = scalar_lea.sflag [#allocation6], %s312_s2 }
  0x34   : > { %929 = dma.done.wait (%p1083_p0), %s313_s4, 128  }
  0x35   : > { %931 = vsyncadd (%p1083_p0), %s313_s4, 4294967168 }
  0x36   : > { %933 = dma.done.wait (%p61_p1), [#allocation6], 256  }
  0x37   : > { %935 = vsyncadd (%p61_p1), [#allocation6], 4294967040 }
  0x38   : > { %937 = dma.done.wait (%p61_p1), [#allocation9], 256  }
  0x39   : > { %939 = vsyncadd (%p61_p1), [#allocation9], 4294967040  ;;  %v652_v0 = vld [vmem:[#allocation8 + $0x8] sm:$0xff]  ;;  %v651_v1 = vld [vmem:[#allocation8] sm:$0xff]  ;;  %vm386_vm0 = vcmask 261120   ;;  %s972_s7 = smov 32  }
  0x3a   : > { %v650_v2 = vld [vmem:[#allocation7 + $0x8] sm:$0xff]  ;;  %432 = vmatpush.bf16.msra.mxu1 %v652_v0  ;;  %v364_v3 = vld [vmem:[%s316_s23] sm:$0xff]  ;;  %v649_v4 = vld [vmem:[#allocation7] sm:$0xff]  ;;  %s622_s8 = sshll.u32 %s1113_s20, 4  ;;  %vm445_vm1 = vcmask 125952   ;;  %s973_s9 = smov 96  }
  0x3b   : > { %396 = vmatpush.bf16.msra.mxu0 %v650_v2  ;;  %v362_v5 = vld [vmem:[%s306_s10] sm:$0xff]  ;;  %v365_v6 = vpack.c.bf16 %v364_v3, %v364_v3  ;;  %s974_s12 = smov 112   ;;  %s360_s15 = scalar_lea.vmem [#allocation10], %s622_s8 }
  0x3c   : > { %v363_v7 = vpack.c.bf16 %v362_v5, %v362_v5  ;;  %v750_v8 = vld [vmem:[%s1191_s5] ss:$0 sm:$0xff]  ;;  %s975_s16 = smov 80   ;;  %s653_s28 = sshll.u32 %s958_s24, 4 }
  0x3d   : > { %v751_v14 = vld [vmem:[%s1189_s3] ss:$0 sm:$0xff]  ;;  %s476_s13 = scalar_lea.hbm %s1192_s6, %s653_s28  ;;  %s477_s11 = sshll.u32 %s360_s15, 4  ;;  %s478_s11 = int_to_ptr.vmem [resolvable:$true] %s477_s11 }
  0x3e   : > { %433 = vmatpush.bf16.msra.mxu1 %v651_v1  ;;  %s479_s14 = sshll.u32 %s476_s13, 4  ;;  %s464_s10 = scalar_lea.sflag [#allocation4], %s1113_s20  ;;  %s480_s14 = int_to_ptr.hbm [resolvable:$true] %s479_s14 }
  0x3f   : > { %397 = vmatpush.bf16.msra.mxu0 %v649_v4  ;;  %s886_s24 = sshra.s32 %s480_s14, 4  ;;  %s892_s25 = scalar_lea.hbm %s1192_s6, 32  ;;  %s887_s24 = int_to_ptr.hbm [resolvable:$true] %s886_s24 }
  0x40   : > { %s888_s2 = scalar_lea.hbm %s887_s24, 16  ;;  %p893_p10 = scmp.lt.s32.totalorder %s887_s24, %s1192_s6 }
  0x41   : > { %640 = vmatmul.msk.bf16.vlgmr.msra.gmra.mxu1 %vm386_vm0, %v365_v6  ;;  %p889_p1 = scmp.ne.s32.totalorder %s887_s24, %s888_s2  ;;  %p894_p11 = scmp.lt.s32.totalorder %s892_s25, %s888_s2 }
  0x42   : > { %631 = vmatmul.msk.bf16.vlgmr.msra.gmra.mxu0 %vm386_vm0, %v363_v7 }
  0x43   : > { %p890_p3 = pnand %p889_p1, %p1087_p2  ;;  %p895_p12 = por %p894_p11, %p893_p10 }
  0x45   : > { %p891_p9 = pneg %p890_p3 }
  0x47   : > { %p896_p13 = pnand %p895_p12, %p891_p9 }
  0xbe   : > { %v435_v9 = vpop.f32.mrf.mxu1 }
  0xbf   : > { %v436_v10 = vadd.f32 %v750_v8, %v435_v9  ;;  %v399_v11 = vpop.f32.mrf.mxu0 }
  0xc0   : > { %v400_v15 = vadd.f32 %v751_v14, %v399_v11 }
  0xc1   : > { %440 = vrot.lane.b32.xlu0 %v436_v10, %s972_s7 }
  0xc6   : > { %v437_v12 = vpop.f32.mrf.mxu1 }
  0xc7   : > { %v401_v13 = vpop.f32.mrf.mxu0 }
 0x133   : > { %v441_v16 = vpop.permute.xlu0 %440 }
 0x134   : > { %v443_v17 = vsel %vm386_vm0, %v400_v15, %v441_v16 }
 0x135   : > { %v444_v18 = vpack.c.bf16 %v443_v17, %v443_v17 }
 0x137   : > { %453 = vrot.lane.b32.xlu1 %v444_v18, %s973_s9  ;;  %448 = vrot.lane.b32.xlu0 %v444_v18, %s974_s12  ;;  %446 = vst.msk [vmem:[%s360_s15] sm:$0xf] %vm445_vm1, %v444_v18 }
 0x13f   : > { %458 = vrot.lane.b32.xlu1 %v444_v18, %s975_s16 }
 0x1a9   : > { %v454_v19 = vpop.permute.xlu1 %453  ;;  %v449_v20 = vpop.permute.xlu0 %448 }
 0x1aa   : > { %642 = vst.msk [vmem:[%s360_s15 + $0x8] sm:$0xf] %vm445_vm1, %v454_v19 }
 0x1ab   : > { %641 = vst.msk [vmem:[%s360_s15 + $0x4] sm:$0xf] %vm445_vm1, %v449_v20 }
 0x1b1   : > { %v459_v21 = vpop.permute.xlu1 %458 }
 0x1b2   : > { %643 = vst.msk [vmem:[%s360_s15 + $0xc] sm:$0xf] %vm445_vm1, %v459_v21 }
 0x1b3   : > { %899 = shalt.err (!%p896_p13)
}
 0x1b4   : > { %s976_s20 = smov 64   ;;  %s977_s18 = smov 4  }
 0x1b5   : > { %666 = dma.vmem_to_hbm [thread:$0]  (%p1087_p2), %s478_s11, 256, %s480_s14, %s464_s10, %s976_s20, %s976_s20, %s977_s18  }
 0x1b6 PF: > { %s494_s8 = sand.u32 1, %s946_s21   ;;  %p683_p0 = pnand %p612_p6, %p1094_p5 }
 0x1b7   : > { %s495_s9 = scalar_lea.sflag [#allocation4], %s494_s8 }
 0x1b8   : > { %p684_p4 = pneg %p683_p0 }
 0x1ba   : > { %941 = dma.done.wait (%p684_p4), %s495_s9, 256  }
 0x1bb   : > { %943 = vsyncadd (%p684_p4), %s495_s9, 4294967040  ;;  %s26_s26 = sadd.s32 1, %s966_s26   ;;  %s1212_s12 = sld [smem:[#allocation16_spill]] }
 0x1bc   : > { %p23_p7 = scmp.ge.s32.totalorder %s26_s26, 4   ;;  %s1213_s23 = sld [smem:[#allocation19_spill]] }
 0x1bd   : > { %s1214_s24 = sld [smem:[#allocation17_spill]]  ;;  %s1216_s21 = smov %s950_s22 }
 0x1be   : > { %s1215_s25 = sld [smem:[#allocation18_spill]]  ;;  %25 = sbr.rel (!%p23_p7) target bundleno = 12 (0xc), region = 113 }
 0x1c1   : > { %s1217_s22 = smov %s1212_s12 }
 0x1c3   :  { %501 = vsyncpa [#allocation3], 1 }
 0x1c4   :  { %503 = vsyncpa [#allocation3 + $0x1], 1 }
 0x1c5   :  { %504 = vsyncpa [#allocation6], 1 }
 0x1c6   :  { %506 = vsyncpa [#allocation6 + $0x1], 1 }
 0x1c7   :  { %507 = vsyncpa [#allocation9], 1 }
 0x1c8   :  { %508 = vsyncpa [#allocation4], 1 }
 0x1c9   :  { %510 = vsyncpa [#allocation4 + $0x1], 1 }

</bundles_post_ra>
